<compile_context>
chip_gen: v7x
topology: tpu7x:2x2x1
jax: 0.10.0
libtpu: 0.0.40
codegen_flags: <defaults>
</compile_context>

<pallas_src>
import jax
import jax.numpy as jnp
from jax.experimental import pallas as pl
from jax.experimental.pallas import tpu as pltpu

LANE = 128       # vreg lane width  (last dim grain)
SUBLANE = 8      # vreg sublane width (second-to-last dim grain)

# bf16 here halves DMA bytes and unlocks the fast MXU path on v6e/v7x once the
# problem scales; kept f32 for exact agreement with the f32 reference.
_MXU_DTYPE = jnp.float32


def _round_up(n, m):
    return ((n + m - 1) // m) * m


# ----------------------------- fused pipe builder ---------------------------

def _build_fused_forward(modules):
    """Build a jitted forward that runs the whole module chain in one
    pallas_call.  Each module contributes pre-padded params, in-kernel apply
    logic, BlockSpecs for its params and a cost estimate."""

    flat_params = []
    counts = []
    for m in modules:
        p = m.kernel_params()
        counts.append(len(p))
        flat_params.extend(p)

    def kernel(x_ref, *rest):
        param_refs, o_ref = rest[:-1], rest[-1]
        x = x_ref[...]
        i = 0
        for m, c in zip(modules, counts):
            vals = tuple(r[...] for r in param_refs[i:i + c])
            x = m.kernel_apply(x, *vals)
            i += c
        o_ref[...] = x.astype(o_ref.dtype)

    def forward(x):
        B, d_in = x.shape
        d_in_p = _round_up(d_in, LANE)

        # True output feature dim of the chain.
        d_out = d_in
        for m in modules:
            d_out = m.out_features(d_out)
        d_out_p = _round_up(d_out, LANE)

        # Batch tiling: lane-dense, sublane-aligned, "parallel" over tiles.
        tb = min(_round_up(B, SUBLANE), 256)
        b_p = _round_up(B, tb)

        x_p = jnp.zeros((b_p, d_in_p), x.dtype).at[:B, :d_in].set(x)

        # Cost estimate (padded dims): flops / transcendentals / bytes.
        flops = 0
        transc = 0
        byts = b_p * (d_in_p + d_out_p) * 4          # activation in + out
        dd = d_in_p
        for m in modules:
            f, t, by, dd = m.cost(b_p, dd)
            flops += f
            transc += t
            byts += by

        in_specs = [pl.BlockSpec((tb, d_in_p), lambda i: (i, 0))]
        for m in modules:
            in_specs.extend(m.kernel_param_specs())
        out_spec = pl.BlockSpec((tb, d_out_p), lambda i: (i, 0))

        y_p = pl.pallas_call(
            kernel,
            out_shape=jax.ShapeDtypeStruct((b_p, d_out_p), x.dtype),
            grid=(b_p // tb,),
            in_specs=in_specs,
            out_specs=out_spec,
            compiler_params=pltpu.CompilerParams(
                dimension_semantics=("parallel",)),
            cost_estimate=pl.CostEstimate(
                flops=flops, transcendentals=transc, bytes_accessed=byts),
        )(x_p, *flat_params)

        return y_p[:B, :d_out]

    return jax.jit(forward)


# ----------------------------- module wrappers ------------------------------

class _KernelModule:
    """Base: modules are standalone-callable via a (cached) 1-module fusion."""
    _solo = None

    def __call__(self, x):
        if self._solo is None:
            self._solo = _build_fused_forward((self,))
        return self._solo(x)


class Linear(_KernelModule):
    """Linear layer; params pre-padded to (128-lane) MXU-friendly shapes."""

    def __init__(self, d_in, d_out, key):
        kw, kb = jax.random.split(key)
        bound = 1.0 / jnp.sqrt(d_in)
        w = jax.random.uniform(kw, (d_in, d_out), jnp.float32, -bound, bound)
        b = jax.random.uniform(kb, (d_out,), jnp.float32, -bound, bound)
        self.d_in, self.d_out = d_in, d_out
        self.w, self.b = w, b                       # unpadded, for reference()

        d_in_p = _round_up(d_in, LANE)
        d_out_p = _round_up(d_out, LANE)
        self.d_in_p, self.d_out_p = d_in_p, d_out_p
        # Zero padding keeps padded columns/rows exactly zero through the pipe.
        self.w_p = jnp.zeros((d_in_p, d_out_p), jnp.float32).at[:d_in, :d_out].set(w)
        self.b_p = jnp.zeros((1, d_out_p), jnp.float32).at[0, :d_out].set(b)

    # --- fused-kernel protocol ---
    def kernel_params(self):
        return (self.w_p, self.b_p)

    def kernel_param_specs(self):
        # Constant index maps: W/b are DMA'd once and stay VMEM-resident
        # across all batch-grid steps.
        return (pl.BlockSpec(self.w_p.shape, lambda i: (0, 0)),
                pl.BlockSpec(self.b_p.shape, lambda i: (0, 0)))

    @staticmethod
    def kernel_apply(x, w, b):
        xm = x.astype(_MXU_DTYPE)
        wm = w.astype(_MXU_DTYPE)
        # f32 accumulation + f32 epilogue (bias add).
        return jnp.dot(xm, wm, preferred_element_type=jnp.float32) + b

    def out_features(self, d_in):
        return self.d_out

    def cost(self, b, d_in_p):
        flops = 2 * b * d_in_p * self.d_out_p
        byts = (self.w_p.size + self.b_p.size) * 4
        return flops, 0, byts, self.d_out_p

    def reference(self, x):
        return x @ self.w + self.b


class Tanh(_KernelModule):
    """Elementwise tanh (EUP) applied inside the fused kernel."""

    # --- fused-kernel protocol ---
    def kernel_params(self):
        return ()

    def kernel_param_specs(self):
        return ()

    @staticmethod
    def kernel_apply(x):
        return jnp.tanh(x)

    def out_features(self, d_in):
        return d_in

    def cost(self, b, d_in_p):
        return 0, b * d_in_p, 0, d_in_p

    def reference(self, x):
        return jnp.tanh(x)


class Pipe:
    """Composition of models, analogous to torch.nn.Sequential (JAX/Pallas).

    The whole chain executes inside a single jitted pallas_call."""

    def __init__(self, *modules):
        self.modules = modules
        for i, mi in enumerate(self.modules):
            setattr(self, f"module{i}", mi)
        self._fused = _build_fused_forward(self.modules)
        # TODO(synk): .loss / .fit / .write / .save / .load are training-harness
        # / serialization features with no Pallas equivalent; only forward is
        # implemented (torch.cuda.empty_cache() has no TPU analogue).

    def forward(self, x):
        # Same result as: xs = [x]; for f in modules: xs.append(f(xs[-1]));
        # but the entire chain is one fused Pallas kernel.
        return self._fused(x)

    def reference(self, x):
        y = x
        for f in self.modules:
            y = f.reference(y)
        return y

    def __matmul__(self, other):
        """Composition of pipes: (self @ other)(x) == self(other(x))."""
        if isinstance(other, Pipe):
            return Pipe(*other.modules, *self.modules)
        return Pipe(other, *self.modules)


# ----------------------------------- main -----------------------------------

if __name__ == "__main__":
    key = jax.random.PRNGKey(0)
    kx, k1, k2 = jax.random.split(key, 3)

    B, D_IN, D_HID, D_OUT = 8, 32, 64, 16
    x = jax.random.normal(kx, (B, D_IN), jnp.float32)

    pipe = Pipe(Linear(D_IN, D_HID, k1), Tanh(), Linear(D_HID, D_OUT, k2))

    y = pipe.forward(x)
    y = jax.block_until_ready(y)

    y_ref = pipe.reference(x)
    assert y.shape == (B, D_OUT)
    assert jnp.allclose(y, y_ref, atol=1e-5, rtol=1e-5), "mismatch vs reference"

    print("KERNEL_OK")
</pallas_src>

<mosaic_0001>
module attributes {stable_mosaic.version = 11 : i64} {
  func.func @kernel(%arg0: i32, %arg1: memref<8x128xf32, #tpu.memory_space<vmem>>, %arg2: memref<128x128xf32, #tpu.memory_space<vmem>>, %arg3: memref<1x128xf32, #tpu.memory_space<vmem>>, %arg4: memref<128x128xf32, #tpu.memory_space<vmem>>, %arg5: memref<1x128xf32, #tpu.memory_space<vmem>>, %arg6: memref<8x128xf32, #tpu.memory_space<vmem>>) attributes {dimension_semantics = [#tpu.dimension_semantics<parallel>], iteration_bounds = array<i64: 1>, scalar_prefetch = 0 : i64, scratch_operands = 0 : i64, tpu.core_type = #tpu.core_type<tc>, window_params = [{transform_indices = @transform_0, window_bounds = array<i64: 8, 128>}, {pipeline_mode = #tpu.pipeline_mode<synchronous>, transform_indices = @transform_1, window_bounds = array<i64: 128, 128>}, {pipeline_mode = #tpu.pipeline_mode<synchronous>, transform_indices = @transform_2, window_bounds = array<i64: 1, 128>}, {pipeline_mode = #tpu.pipeline_mode<synchronous>, transform_indices = @transform_3, window_bounds = array<i64: 128, 128>}, {pipeline_mode = #tpu.pipeline_mode<synchronous>, transform_indices = @transform_4, window_bounds = array<i64: 1, 128>}, {transform_indices = @transform_5, window_bounds = array<i64: 8, 128>}]} {
    %c0 = arith.constant 0 : index
    %c0_0 = arith.constant 0 : index
    %0 = vector.load %arg1[%c0, %c0_0] : memref<8x128xf32, #tpu.memory_space<vmem>>, vector<8x128xf32>
    %c0_1 = arith.constant 0 : index
    %c0_2 = arith.constant 0 : index
    %1 = vector.load %arg2[%c0_1, %c0_2] : memref<128x128xf32, #tpu.memory_space<vmem>>, vector<128x128xf32>
    %c0_3 = arith.constant 0 : index
    %c0_4 = arith.constant 0 : index
    %2 = vector.load %arg3[%c0_3, %c0_4] : memref<1x128xf32, #tpu.memory_space<vmem>>, vector<1x128xf32>
    %cst = arith.constant dense<0.000000e+00> : vector<8x128xf32>
    %3 = tpu.matmul %0, %1, %cst {dimension_numbers = #tpu.dot_dimension_numbers<[1], [0], [0], [1], [0, 0, 1, 1], [], []>} : vector<8x128xf32>, vector<128x128xf32>, vector<8x128xf32> -> vector<8x128xf32>
    %4 = vector.broadcast %2 : vector<1x128xf32> to vector<8x128xf32>
    %5 = arith.addf %3, %4 : vector<8x128xf32>
    %6 = math.tanh %5 : vector<8x128xf32>
    %c0_5 = arith.constant 0 : index
    %c0_6 = arith.constant 0 : index
    %7 = vector.load %arg4[%c0_5, %c0_6] : memref<128x128xf32, #tpu.memory_space<vmem>>, vector<128x128xf32>
    %c0_7 = arith.constant 0 : index
    %c0_8 = arith.constant 0 : index
    %8 = vector.load %arg5[%c0_7, %c0_8] : memref<1x128xf32, #tpu.memory_space<vmem>>, vector<1x128xf32>
    %cst_9 = arith.constant dense<0.000000e+00> : vector<8x128xf32>
    %9 = tpu.matmul %6, %7, %cst_9 {dimension_numbers = #tpu.dot_dimension_numbers<[1], [0], [0], [1], [0, 0, 1, 1], [], []>} : vector<8x128xf32>, vector<128x128xf32>, vector<8x128xf32> -> vector<8x128xf32>
    %10 = vector.broadcast %8 : vector<1x128xf32> to vector<8x128xf32>
    %11 = arith.addf %9, %10 : vector<8x128xf32>
    %c0_10 = arith.constant 0 : index
    %c0_11 = arith.constant 0 : index
    %12 = vector.load %arg6[%c0_10, %c0_11] : memref<8x128xf32, #tpu.memory_space<vmem>>, vector<8x128xf32>
    tpu.vector_store %arg6[%c0_10, %c0_11], %11 {strides = array<i32>} : memref<8x128xf32, #tpu.memory_space<vmem>>, vector<8x128xf32>,
    return
  }
  func.func @transform_0(%arg0: i32) -> (i32, i32) {
    %c0_i32 = arith.constant 0 : i32
    %c0_i32_0 = arith.constant 0 : i32
    return %arg0, %c0_i32 : i32, i32
  }
  func.func @transform_1(%arg0: i32) -> (i32, i32) {
    %c0_i32 = arith.constant 0 : i32
    %c0_i32_0 = arith.constant 0 : i32
    %c0_i32_1 = arith.constant 0 : i32
    return %c0_i32, %c0_i32_0 : i32, i32
  }
  func.func @transform_2(%arg0: i32) -> (i32, i32) {
    %c0_i32 = arith.constant 0 : i32
    %c0_i32_0 = arith.constant 0 : i32
    %c0_i32_1 = arith.constant 0 : i32
    return %c0_i32, %c0_i32_0 : i32, i32
  }
  func.func @transform_3(%arg0: i32) -> (i32, i32) {
    %c0_i32 = arith.constant 0 : i32
    %c0_i32_0 = arith.constant 0 : i32
    %c0_i32_1 = arith.constant 0 : i32
    return %c0_i32, %c0_i32_0 : i32, i32
  }
  func.func @transform_4(%arg0: i32) -> (i32, i32) {
    %c0_i32 = arith.constant 0 : i32
    %c0_i32_0 = arith.constant 0 : i32
    %c0_i32_1 = arith.constant 0 : i32
    return %c0_i32, %c0_i32_0 : i32, i32
  }
  func.func @transform_5(%arg0: i32) -> (i32, i32) {
    %c0_i32 = arith.constant 0 : i32
    %c0_i32_0 = arith.constant 0 : i32
    return %arg0, %c0_i32 : i32, i32
  }
}

</mosaic_0001>

<bundles_post_ra>
// kernel: forward.1
= control target key start
LH: loop header
LB: loop body
LE: loop exit
PB: predicated region body
PF: predicated region fallthrough
CT: control target
= control target key end

     0   :  { %10 = vsyncpa [#allocation3], 0  ;;  %s589_s0 = inlined_call_operand.vmem [shape: f32[8,128], index: 0, kind: input, shape index: {}]   ;;  %s590_s1 = inlined_call_operand.hbm [shape: f32[128,128], index: 1, kind: input, shape index: {}]   ;;  %s591_s2 = inlined_call_operand.vmem [shape: f32[1,128], index: 2, kind: input, shape index: {}]   ;;  %s592_s3 = inlined_call_operand.hbm [shape: f32[128,128], index: 3, kind: input, shape index: {}]   ;;  %s593_s4 = inlined_call_operand.vmem [shape: f32[1,128], index: 4, kind: input, shape index: {}]   ;;  %s594_s5 = inlined_call_operand.hbm [shape: f32[8,128], index: 5, kind: output, shape index: {}]  }
   0x1   :  { %11 = vsyncpa [#allocation6], 0 }
   0x2   :  { %12 = vsyncpa [#allocation4], 0  ;;  %s490_s18 = smov [#allocation2]   ;;  %s418_s22 = scalar_lea.hbm %s590_s1, 2048 }
   0x3   :  { %s20_s19 = sshll.u32 %s490_s18, 4  ;;  %p419_p0 = scmp.ne.s32.totalorder %s590_s1, %s418_s22  ;;  %s21_s19 = int_to_ptr.vmem [resolvable:$true] %s20_s19 }
   0x4   :  { %p422_p1 = scmp.lt.u32.totalorder %s418_s22, %s590_s1 }
   0x6   :  { %p424_p2 = pnand %p422_p1, %p419_p0 }
   0x8   :  { %427 = shalt.err (!%p424_p2)
}
   0x9   :  { %s428_s27 = scalar_lea.vmem %s21_s19, 2048  ;;  %p433_p4 = scmp.lt.s32.totalorder %s21_s19, %s21_s19 }
   0xa   :  { %p429_p3 = scmp.ne.s32.totalorder %s21_s19, %s428_s27  ;;  %p434_p5 = scmp.lt.s32.totalorder %s428_s27, %s428_s27 }
   0xc   :  { %p435_p6 = por %p434_p5, %p433_p4 }
   0xe   :  { %p436_p7 = pnand %p435_p6, %p429_p3 }
  0x10   :  { %439 = shalt.err (!%p436_p7)
}
  0x11   :  { %s491_s28 = smov 128   ;;  %s492_s29 = smov 8  }
  0x12   :  { %26 = dma.hbm_to_vmem [thread:$0]  %s590_s1, 2048, %s21_s19, [#allocation3], %s491_s28, %s491_s28, %s492_s29  }
  0x13   :  { %s493_s7 = smov [#allocation5]   ;;  %s440_s11 = scalar_lea.hbm %s592_s3, 2048 }
  0x14   :  { %s34_s8 = sshll.u32 %s493_s7, 4  ;;  %p441_p8 = scmp.ne.s32.totalorder %s592_s3, %s440_s11  ;;  %s35_s8 = int_to_ptr.vmem [resolvable:$true] %s34_s8 }
  0x15   :  { %p444_p9 = scmp.lt.u32.totalorder %s440_s11, %s592_s3 }
  0x17   :  { %p446_p10 = pnand %p444_p9, %p441_p8 }
  0x19   :  { %449 = shalt.err (!%p446_p10)
}
  0x1a   :  { %s450_s16 = scalar_lea.vmem %s35_s8, 2048  ;;  %p455_p12 = scmp.lt.s32.totalorder %s35_s8, %s35_s8 }
  0x1b   :  { %p451_p11 = scmp.ne.s32.totalorder %s35_s8, %s450_s16  ;;  %p456_p13 = scmp.lt.s32.totalorder %s450_s16, %s450_s16 }
  0x1d   :  { %p457_p0 = por %p456_p13, %p455_p12 }
  0x1f   :  { %p458_p1 = pnand %p457_p0, %p451_p11 }
  0x21   :  { %461 = shalt.err (!%p458_p1)
}
  0x22   :  { %40 = dma.hbm_to_vmem [thread:$0]  %s592_s3, 2048, %s35_s8, [#allocation6], %s491_s28, %s491_s28, %s492_s29  }
  0x23   :  { %484 = dma.done.wait [#allocation3], 2048  }
  0x24   :  { %485 = vsyncadd [#allocation3], 4294965248 }
  0x25   :  { %486 = dma.done.wait [#allocation6], 2048  }
  0x26   :  { %487 = vsyncadd [#allocation6], 4294965248  ;;  %v494_v0 = vmov 0.0|0.0   ;;  %vm495_vm0 = vmmov 0   ;;  %v496_v1 = vmov 0.0   ;;  %v50_v2 = vld [vmem:[#allocation2] sm:$0xff] }
  0x27   :  { %360 = vmatprep.subr.bf16.mxu0 %v494_v0  ;;  %322 = vmatprep.mubr.msk.f32.mxu0 %vm495_vm0, %v496_v1  ;;  %v51_v3 = vld [vmem:[#allocation2 + $0x8] sm:$0xff]  ;;  %v52_v4 = vld [vmem:[#allocation2 + $0x10] sm:$0xff]  ;;  %v53_v6 = vld [vmem:[#allocation2 + $0x18] sm:$0xff]  ;;  %s497_s22 = smov [#allocation7]  }
  0x28   :  { %384 = vmatprep.subr.bf16.mxu1 %v494_v0  ;;  %357 = vmatprep.mubr.msk.f32.mxu1 %vm495_vm0, %v496_v1  ;;  %v361_v5 = vpack.c.bf16 %v51_v3, %v50_v2  ;;  %v364_v7 = vpack.c.bf16 %v53_v6, %v52_v4  ;;  %v54_v8 = vld [vmem:[#allocation2 + $0x20] sm:$0xff]  ;;  %v55_v9 = vld [vmem:[#allocation2 + $0x28] sm:$0xff]  ;;  %v146_v12 = vld [vmem:[#allocation5 + $0x10] sm:$0xff]  ;;  %s244_s23 = sshll.u32 %s497_s22, 4  ;;  %s245_s23 = int_to_ptr.vmem [resolvable:$true] %s244_s23 }
  0x29   :  { %v144_v10 = vld [vmem:[#allocation5] sm:$0xff]  ;;  %v145_v11 = vld [vmem:[#allocation5 + $0x8] sm:$0xff]  ;;  %v147_v13 = vld [vmem:[#allocation5 + $0x18] sm:$0xff]  ;;  %v367_v14 = vpack.c.bf16 %v55_v9, %v54_v8  ;;  %s462_s24 = scalar_lea.vmem %s245_s23, 128  ;;  %p467_p3 = scmp.lt.s32.totalorder %s245_s23, %s245_s23 }
  0x2a   :  { %362 = vmatpush3.bf16.msra.mxu0 %v361_v5  ;;  %v385_v15 = vpack.c.bf16 %v145_v11, %v144_v10  ;;  %v56_v16 = vld [vmem:[#allocation2 + $0x30] sm:$0xff]  ;;  %v57_v17 = vld [vmem:[#allocation2 + $0x38] sm:$0xff]  ;;  %v388_v18 = vpack.c.bf16 %v147_v13, %v146_v12  ;;  %v148_v19 = vld [vmem:[#allocation5 + $0x20] sm:$0xff]  ;;  %p463_p2 = scmp.ne.s32.totalorder %s245_s23, %s462_s24  ;;  %p468_p4 = scmp.lt.s32.totalorder %s462_s24, %s462_s24 }
  0x2b   :  { %363 = vmatprep.subr.bf16.mxu0 %v494_v0  ;;  %v149_v20 = vld [vmem:[#allocation5 + $0x28] sm:$0xff]  ;;  %v370_v21 = vpack.c.bf16 %v57_v17, %v56_v16  ;;  %v58_v22 = vld [vmem:[#allocation2 + $0x40] sm:$0xff]  ;;  %v150_v25 = vld [vmem:[#allocation5 + $0x30] sm:$0xff] }
  0x2c   :  { %386 = vmatpush3.bf16.msra.mxu1 %v385_v15  ;;  %v59_v23 = vld [vmem:[#allocation2 + $0x48] sm:$0xff]  ;;  %v391_v24 = vpack.c.bf16 %v149_v20, %v148_v19  ;;  %v151_v26 = vld [vmem:[#allocation5 + $0x38] sm:$0xff]  ;;  %v60_v28 = vld [vmem:[#allocation2 + $0x50] sm:$0xff]  ;;  %p469_p5 = por %p468_p4, %p467_p3 }
  0x2d   :  { %387 = vmatprep.subr.bf16.mxu1 %v494_v0  ;;  %v373_v27 = vpack.c.bf16 %v59_v23, %v58_v22  ;;  %v61_v29 = vld [vmem:[#allocation2 + $0x58] sm:$0xff]  ;;  %v394_v30 = vpack.c.bf16 %v151_v26, %v150_v25  ;;  %v152_v31 = vld [vmem:[#allocation5 + $0x40] sm:$0xff]  ;;  %v153_v32 = vld [vmem:[#allocation5 + $0x48] sm:$0xff] }
  0x2e   :  { %365 = vmatpush3.bf16.msra.mxu0 %v364_v7  ;;  %v376_v33 = vpack.c.bf16 %v61_v29, %v60_v28  ;;  %v62_v34 = vld [vmem:[#allocation2 + $0x60] sm:$0xff]  ;;  %v63_v35 = vld [vmem:[#allocation2 + $0x68] sm:$0xff]  ;;  %v397_v36 = vpack.c.bf16 %v153_v32, %v152_v31  ;;  %v64_v38 = vld [vmem:[#allocation2 + $0x70] sm:$0xff]  ;;  %p470_p6 = pnand %p469_p5, %p463_p2 }
  0x2f   :  { %366 = vmatprep.subr.bf16.mxu0 %v494_v0  ;;  %v379_v37 = vpack.c.bf16 %v63_v35, %v62_v34  ;;  %v65_v39 = vld [vmem:[#allocation2 + $0x78] sm:$0xff]  ;;  %v49_v41 = vld [vmem:[%s589_s0] sm:$0xff]  ;;  %v154_v42 = vld [vmem:[#allocation5 + $0x50] sm:$0xff] }
  0x30   :  { %389 = vmatpush3.bf16.msra.mxu1 %v388_v18  ;;  %v382_v40 = vpack.c.bf16 %v65_v39, %v64_v38  ;;  %v155_v43 = vld [vmem:[#allocation5 + $0x58] sm:$0xff]  ;;  %v156_v45 = vld [vmem:[#allocation5 + $0x60] sm:$0xff]  ;;  %v157_v46 = vld [vmem:[#allocation5 + $0x68] sm:$0xff] }
  0x31   :  { %390 = vmatprep.subr.bf16.mxu1 %v494_v0  ;;  %v400_v44 = vpack.c.bf16 %v155_v43, %v154_v42  ;;  %v403_v47 = vpack.c.bf16 %v157_v46, %v156_v45  ;;  %v158_v48 = vld [vmem:[#allocation5 + $0x70] sm:$0xff]  ;;  %v159_v49 = vld [vmem:[#allocation5 + $0x78] sm:$0xff]  ;;  %v254_v51 = vld [vmem:[%s591_s2] ss:$0 sm:$0xff] }
  0x32   :  { %368 = vmatpush3.bf16.msra.mxu0 %v367_v14  ;;  %v406_v50 = vpack.c.bf16 %v159_v49, %v158_v48  ;;  %v255_v56 = vld [vmem:[%s593_s4] ss:$0 sm:$0xff] }
  0x33   :  { %369 = vmatprep.subr.bf16.mxu0 %v494_v0 }
  0x34   :  { %392 = vmatpush3.bf16.msra.mxu1 %v391_v24 }
  0x35   :  { %393 = vmatprep.subr.bf16.mxu1 %v494_v0 }
  0x36   :  { %371 = vmatpush3.bf16.msra.mxu0 %v370_v21 }
  0x37   :  { %372 = vmatprep.subr.bf16.mxu0 %v494_v0 }
  0x38   :  { %395 = vmatpush3.bf16.msra.mxu1 %v394_v30 }
  0x39   :  { %396 = vmatprep.subr.bf16.mxu1 %v494_v0 }
  0x3a   :  { %374 = vmatpush3.bf16.msra.mxu0 %v373_v27 }
  0x3b   :  { %375 = vmatprep.subr.bf16.mxu0 %v494_v0 }
  0x3c   :  { %398 = vmatpush3.bf16.msra.mxu1 %v397_v36 }
  0x3d   :  { %399 = vmatprep.subr.bf16.mxu1 %v494_v0 }
  0x3e   :  { %377 = vmatpush3.bf16.msra.mxu0 %v376_v33 }
  0x3f   :  { %378 = vmatprep.subr.bf16.mxu0 %v494_v0 }
  0x40   :  { %401 = vmatpush3.bf16.msra.mxu1 %v400_v44 }
  0x41   :  { %402 = vmatprep.subr.bf16.mxu1 %v494_v0 }
  0x42   :  { %380 = vmatpush3.bf16.msra.mxu0 %v379_v37 }
  0x43   :  { %381 = vmatprep.subr.bf16.mxu0 %v494_v0 }
  0x44   :  { %404 = vmatpush3.bf16.msra.mxu1 %v403_v47 }
  0x45   :  { %405 = vmatprep.subr.bf16.mxu1 %v494_v0 }
  0x46   :  { %383 = vmatpush3.bf16.msra.mxu0 %v382_v40 }
  0x48   :  { %407 = vmatpush3.bf16.msra.mxu1 %v406_v50 }
  0x49   :  { %323 = vmatmul.mubr.f32.vlgmr.msra.gmra.mrb[0].mxu0 %v49_v41 }
 0x11c   :  { %v139_v52 = vpop.f32.mrb[0].mxu0 }
 0x11d   :  { %v140_v53 = vadd.f32 %v254_v51, %v139_v52  ;;  %v324_v54 = vpop.f32.mrb[1].mxu0 }
 0x11f   :  { %416 = vtanh.f32 %v140_v53 }
 0x129   :  { %v417_v55 = vpop.eup %416 }
 0x12a   :  { %358 = vmatmul.mubr.f32.vlgmr.msra.gmra.mrb[0].mxu1 %v417_v55 }
 0x1fd   :  { %v233_v57 = vpop.f32.mrb[0].mxu1 }
 0x1fe   :  { %v234_v58 = vadd.f32 %v255_v56, %v233_v57  ;;  %v359_v59 = vpop.f32.mrb[1].mxu1 }
 0x200   :  { %237 = vst [vmem:[#allocation7] sm:$0xff] %v234_v58 }
 0x201   :  { %473 = shalt.err (!%p470_p6)
}
 0x202   :  { %s474_s26 = scalar_lea.hbm %s594_s5, 128 }
 0x203   :  { %p475_p7 = scmp.ne.s32.totalorder %s594_s5, %s474_s26  ;;  %p478_p8 = scmp.lt.u32.totalorder %s474_s26, %s594_s5 }
 0x205   :  { %p480_p9 = pnand %p478_p8, %p475_p7 }
 0x207   :  { %483 = shalt.err (!%p480_p9)
}
 0x208   :  { %247 = dma.vmem_to_hbm [thread:$0]  %s245_s23, 128, %s594_s5, [#allocation4]  }
 0x209   :  { %488 = dma.done.wait [#allocation4], 128  }
 0x20a   :  { %489 = vsyncadd [#allocation4], 4294967168 }
 0x20b   :  { %251 = vsyncpa [#allocation3], 1 }
 0x20c   :  { %252 = vsyncpa [#allocation6], 1 }
 0x20d   :  { %253 = vsyncpa [#allocation4], 1 }

</bundles_post_ra>
